<compile_context>
chip_gen: v7x
topology: tpu7x:2x2x1
jax: 0.10.0
libtpu: 0.0.40
codegen_flags: <defaults>
</compile_context>

<pallas_src>
import jax
import jax.numpy as jnp
import numpy as np
from jax.experimental import pallas as pl
from jax.experimental.pallas import tpu as pltpu

N_HIDDEN = 128
BN_EPS = 1e-5
NEG_SLOPE = 0.2


# ------------------------------ Pallas kernel --------------------------------
def _convproj_kernel(x_ref, w1, b1, w2, b2, w3, b3, out_ref):
    # x tile: (TB, C_in) f32.  Weights are bf16 (BN pre-folded), biases f32.
    x = x_ref[...].astype(jnp.bfloat16)

    h = jnp.dot(x, w1[...], preferred_element_type=jnp.float32) + b1[...]
    h = jnp.maximum(h, NEG_SLOPE * h)                 # LeakyReLU(0.2)

    h = jnp.dot(h.astype(jnp.bfloat16), w2[...],
                preferred_element_type=jnp.float32) + b2[...]
    h = jnp.maximum(h, NEG_SLOPE * h)

    out = jnp.dot(h.astype(jnp.bfloat16), w3[...],
                  preferred_element_type=jnp.float32) + b3[...]
    out_ref[...] = out.astype(out_ref.dtype)


# ------------------------- host-side parameter folding -----------------------
def fold_params(p):
    """Fold eval-mode BN into the 1x1 conv weights; transpose to (in, out)."""
    def fold_conv_bn(wc, bc, gamma, beta, mean, var):
        s = gamma / jnp.sqrt(var + BN_EPS)            # (out,)
        w = (wc * s[:, None]).T                       # (in, out)
        b = bc * s + beta - mean * s                  # (out,)
        return w.astype(jnp.bfloat16), b[None, :].astype(jnp.float32)

    w1, b1 = fold_conv_bn(p["w1"], p["b1"], p["g1"], p["be1"], p["m1"], p["v1"])
    w2, b2 = fold_conv_bn(p["w2"], p["b2"], p["g2"], p["be2"], p["m2"], p["v2"])
    w3 = p["w3"].T.astype(jnp.bfloat16)
    b3 = p["b3"][None, :].astype(jnp.float32)
    return w1, b1, w2, b2, w3, b3


# ----------------------------------- wrapper ----------------------------------
def convproj_forward(feat, params, *, tile=256):
    """feat: (B, C, H, W) float32 -> (B, C, H, W) float32."""
    w1, b1, w2, b2, w3, b3 = fold_params(params)

    B, C, H, Wd = feat.shape
    # NCHW -> (pixels, channels): channels land on the lane axis.
    x = jnp.transpose(feat, (0, 2, 3, 1)).reshape(-1, C)
    n = x.shape[0]
    n_pad = pl.cdiv(n, tile) * tile
    if n_pad != n:
        x = jnp.pad(x, ((0, n_pad - n), (0, 0)))

    const = lambda i: (0, 0)       # weights: same block every step -> one DMA
    out = pl.pallas_call(
        _convproj_kernel,
        out_shape=jax.ShapeDtypeStruct((n_pad, C), jnp.float32),
        grid=(n_pad // tile,),
        in_specs=[
            pl.BlockSpec((tile, C), lambda i: (i, 0)),     # x tile (pipelined)
            pl.BlockSpec(w1.shape, const),
            pl.BlockSpec(b1.shape, const),
            pl.BlockSpec(w2.shape, const),
            pl.BlockSpec(b2.shape, const),
            pl.BlockSpec(w3.shape, const),
            pl.BlockSpec(b3.shape, const),
        ],
        out_specs=pl.BlockSpec((tile, C), lambda i: (i, 0)),
        compiler_params=pltpu.CompilerParams(
            dimension_semantics=("parallel",),             # 2x on v7x megacore
        ),
    )(x, w1, b1, w2, b2, w3, b3)

    out = out[:n].reshape(B, H, Wd, C)
    return jnp.transpose(out, (0, 3, 1, 2))


# ----------------------- deterministic parameter init ------------------------
def init_params(key, num_feat):
    def conv_init(k, out_f, in_f):
        # nn.Conv2d default: kaiming_uniform_(a=sqrt(5)) -> bound = 1/sqrt(fan_in)
        kw, kb = jax.random.split(k)
        bound = 1.0 / np.sqrt(in_f)
        w = jax.random.uniform(kw, (out_f, in_f), jnp.float32, -bound, bound)
        b = jax.random.uniform(kb, (out_f,), jnp.float32, -bound, bound)
        return w, b

    def bn_init(k, n):
        k1, k2, k3, k4 = jax.random.split(k, 4)
        gamma = jax.random.uniform(k1, (n,), jnp.float32, 0.5, 1.5)
        beta = 0.1 * jax.random.normal(k2, (n,), jnp.float32)
        mean = 0.1 * jax.random.normal(k3, (n,), jnp.float32)
        var = jax.random.uniform(k4, (n,), jnp.float32, 0.5, 1.5)
        return gamma, beta, mean, var

    k = jax.random.split(key, 5)
    w1, b1 = conv_init(k[0], N_HIDDEN, num_feat)
    g1, be1, m1, v1 = bn_init(k[1], N_HIDDEN)
    w2, b2 = conv_init(k[2], N_HIDDEN, N_HIDDEN)
    g2, be2, m2, v2 = bn_init(k[3], N_HIDDEN)
    w3, b3 = conv_init(k[4], num_feat, N_HIDDEN)
    return dict(w1=w1, b1=b1, g1=g1, be1=be1, m1=m1, v1=v1,
                w2=w2, b2=b2, g2=g2, be2=be2, m2=m2, v2=v2,
                w3=w3, b3=b3)


# ------------------------------ pure-JAX reference ----------------------------
def convproj_reference(feat, p):
    def conv1x1(x, w, b):   # x: (B,Cin,H,W); w: (Cout,Cin); b: (Cout,)
        return jnp.einsum("bchw,oc->bohw", x, w) + b[None, :, None, None]

    def bn(x, gamma, beta, mean, var):
        s = gamma / jnp.sqrt(var + BN_EPS)
        return x * s[None, :, None, None] + (beta - mean * s)[None, :, None, None]

    def lrelu(x):
        return jnp.where(x > 0, x, NEG_SLOPE * x)

    h = lrelu(bn(conv1x1(feat, p["w1"], p["b1"]), p["g1"], p["be1"], p["m1"], p["v1"]))
    h = lrelu(bn(conv1x1(h, p["w2"], p["b2"]), p["g2"], p["be2"], p["m2"], p["v2"]))
    return conv1x1(h, p["w3"], p["b3"])


# ------------------------------------ main ------------------------------------
if __name__ == "__main__":
    key = jax.random.PRNGKey(0)
    kx, kp = jax.random.split(key)

    num_feat, B, H, Wd = 16, 2, 16, 16
    feat = jax.random.normal(kx, (B, num_feat, H, Wd), jnp.float32)
    params = init_params(kp, num_feat)

    out = convproj_forward(feat, params, tile=256)
    out = jax.block_until_ready(out)
    assert out.shape == (B, num_feat, H, Wd), out.shape

    ref = convproj_reference(feat, params)
    # bf16 MXU operands (f32 accumulate) -> loosened tolerance vs f32 reference.
    np.testing.assert_allclose(np.asarray(out), np.asarray(ref), rtol=2e-2, atol=2e-2)

    print("KERNEL_OK")
</pallas_src>

<mosaic_0001>
module attributes {stable_mosaic.version = 11 : i64} {
  func.func @_convproj_kernel(%arg0: i32, %arg1: memref<256x16xf32, #tpu.memory_space<vmem>>, %arg2: memref<16x128xbf16, #tpu.memory_space<vmem>>, %arg3: memref<1x128xf32, #tpu.memory_space<vmem>>, %arg4: memref<128x128xbf16, #tpu.memory_space<vmem>>, %arg5: memref<1x128xf32, #tpu.memory_space<vmem>>, %arg6: memref<128x16xbf16, #tpu.memory_space<vmem>>, %arg7: memref<1x16xf32, #tpu.memory_space<vmem>>, %arg8: memref<256x16xf32, #tpu.memory_space<vmem>>) attributes {dimension_semantics = [#tpu.dimension_semantics<parallel>], iteration_bounds = array<i64: 2>, scalar_prefetch = 0 : i64, scratch_operands = 0 : i64, tpu.core_type = #tpu.core_type<tc>, window_params = [{transform_indices = @transform_0, window_bounds = array<i64: 256, 16>}, {pipeline_mode = #tpu.pipeline_mode<synchronous>, transform_indices = @transform_1, window_bounds = array<i64: 16, 128>}, {pipeline_mode = #tpu.pipeline_mode<synchronous>, transform_indices = @transform_2, window_bounds = array<i64: 1, 128>}, {pipeline_mode = #tpu.pipeline_mode<synchronous>, transform_indices = @transform_3, window_bounds = array<i64: 128, 128>}, {pipeline_mode = #tpu.pipeline_mode<synchronous>, transform_indices = @transform_4, window_bounds = array<i64: 1, 128>}, {pipeline_mode = #tpu.pipeline_mode<synchronous>, transform_indices = @transform_5, window_bounds = array<i64: 128, 16>}, {pipeline_mode = #tpu.pipeline_mode<synchronous>, transform_indices = @transform_6, window_bounds = array<i64: 1, 16>}, {transform_indices = @transform_7, window_bounds = array<i64: 256, 16>}]} {
    %c0 = arith.constant 0 : index
    %c0_0 = arith.constant 0 : index
    %0 = vector.load %arg1[%c0, %c0_0] : memref<256x16xf32, #tpu.memory_space<vmem>>, vector<256x16xf32>
    %1 = arith.truncf %0 : vector<256x16xf32> to vector<256x16xbf16>
    %c0_1 = arith.constant 0 : index
    %c0_2 = arith.constant 0 : index
    %2 = vector.load %arg2[%c0_1, %c0_2] : memref<16x128xbf16, #tpu.memory_space<vmem>>, vector<16x128xbf16>
    %cst = arith.constant dense<0.000000e+00> : vector<256x128xf32>
    %3 = tpu.matmul %1, %2, %cst {dimension_numbers = #tpu.dot_dimension_numbers<[1], [0], [0], [1], [0, 0, 1, 1], [], []>} : vector<256x16xbf16>, vector<16x128xbf16>, vector<256x128xf32> -> vector<256x128xf32>
    %c0_3 = arith.constant 0 : index
    %c0_4 = arith.constant 0 : index
    %4 = vector.load %arg3[%c0_3, %c0_4] : memref<1x128xf32, #tpu.memory_space<vmem>>, vector<1x128xf32>
    %5 = vector.broadcast %4 : vector<1x128xf32> to vector<256x128xf32>
    %6 = arith.addf %3, %5 : vector<256x128xf32>
    %cst_5 = arith.constant 2.000000e-01 : f32
    %7 = vector.broadcast %cst_5 : f32 to vector<256x128xf32>
    %8 = arith.mulf %7, %6 : vector<256x128xf32>
    %9 = arith.maximumf %6, %8 : vector<256x128xf32>
    %10 = arith.truncf %9 : vector<256x128xf32> to vector<256x128xbf16>
    %c0_6 = arith.constant 0 : index
    %c0_7 = arith.constant 0 : index
    %11 = vector.load %arg4[%c0_6, %c0_7] : memref<128x128xbf16, #tpu.memory_space<vmem>>, vector<128x128xbf16>
    %cst_8 = arith.constant dense<0.000000e+00> : vector<256x128xf32>
    %12 = tpu.matmul %10, %11, %cst_8 {dimension_numbers = #tpu.dot_dimension_numbers<[1], [0], [0], [1], [0, 0, 1, 1], [], []>} : vector<256x128xbf16>, vector<128x128xbf16>, vector<256x128xf32> -> vector<256x128xf32>
    %c0_9 = arith.constant 0 : index
    %c0_10 = arith.constant 0 : index
    %13 = vector.load %arg5[%c0_9, %c0_10] : memref<1x128xf32, #tpu.memory_space<vmem>>, vector<1x128xf32>
    %14 = vector.broadcast %13 : vector<1x128xf32> to vector<256x128xf32>
    %15 = arith.addf %12, %14 : vector<256x128xf32>
    %cst_11 = arith.constant 2.000000e-01 : f32
    %16 = vector.broadcast %cst_11 : f32 to vector<256x128xf32>
    %17 = arith.mulf %16, %15 : vector<256x128xf32>
    %18 = arith.maximumf %15, %17 : vector<256x128xf32>
    %19 = arith.truncf %18 : vector<256x128xf32> to vector<256x128xbf16>
    %c0_12 = arith.constant 0 : index
    %c0_13 = arith.constant 0 : index
    %20 = vector.load %arg6[%c0_12, %c0_13] : memref<128x16xbf16, #tpu.memory_space<vmem>>, vector<128x16xbf16>
    %cst_14 = arith.constant dense<0.000000e+00> : vector<256x16xf32>
    %21 = tpu.matmul %19, %20, %cst_14 {dimension_numbers = #tpu.dot_dimension_numbers<[1], [0], [0], [1], [0, 0, 1, 1], [], []>} : vector<256x128xbf16>, vector<128x16xbf16>, vector<256x16xf32> -> vector<256x16xf32>
    %c0_15 = arith.constant 0 : index
    %c0_16 = arith.constant 0 : index
    %22 = vector.load %arg7[%c0_15, %c0_16] : memref<1x16xf32, #tpu.memory_space<vmem>>, vector<1x16xf32>
    %23 = vector.broadcast %22 : vector<1x16xf32> to vector<256x16xf32>
    %24 = arith.addf %21, %23 : vector<256x16xf32>
    %c0_17 = arith.constant 0 : index
    %c0_18 = arith.constant 0 : index
    %25 = vector.load %arg8[%c0_17, %c0_18] : memref<256x16xf32, #tpu.memory_space<vmem>>, vector<256x16xf32>
    tpu.vector_store %arg8[%c0_17, %c0_18], %24 {strides = array<i32>} : memref<256x16xf32, #tpu.memory_space<vmem>>, vector<256x16xf32>,
    return
  }
  func.func @transform_0(%arg0: i32) -> (i32, i32) {
    %c0_i32 = arith.constant 0 : i32
    %c0_i32_0 = arith.constant 0 : i32
    return %arg0, %c0_i32 : i32, i32
  }
  func.func @transform_1(%arg0: i32) -> (i32, i32) {
    %c0_i32 = arith.constant 0 : i32
    %c0_i32_0 = arith.constant 0 : i32
    %c0_i32_1 = arith.constant 0 : i32
    return %c0_i32, %c0_i32_0 : i32, i32
  }
  func.func @transform_2(%arg0: i32) -> (i32, i32) {
    %c0_i32 = arith.constant 0 : i32
    %c0_i32_0 = arith.constant 0 : i32
    %c0_i32_1 = arith.constant 0 : i32
    return %c0_i32, %c0_i32_0 : i32, i32
  }
  func.func @transform_3(%arg0: i32) -> (i32, i32) {
    %c0_i32 = arith.constant 0 : i32
    %c0_i32_0 = arith.constant 0 : i32
    %c0_i32_1 = arith.constant 0 : i32
    return %c0_i32, %c0_i32_0 : i32, i32
  }
  func.func @transform_4(%arg0: i32) -> (i32, i32) {
    %c0_i32 = arith.constant 0 : i32
    %c0_i32_0 = arith.constant 0 : i32
    %c0_i32_1 = arith.constant 0 : i32
    return %c0_i32, %c0_i32_0 : i32, i32
  }
  func.func @transform_5(%arg0: i32) -> (i32, i32) {
    %c0_i32 = arith.constant 0 : i32
    %c0_i32_0 = arith.constant 0 : i32
    %c0_i32_1 = arith.constant 0 : i32
    return %c0_i32, %c0_i32_0 : i32, i32
  }
  func.func @transform_6(%arg0: i32) -> (i32, i32) {
    %c0_i32 = arith.constant 0 : i32
    %c0_i32_0 = arith.constant 0 : i32
    %c0_i32_1 = arith.constant 0 : i32
    return %c0_i32, %c0_i32_0 : i32, i32
  }
  func.func @transform_7(%arg0: i32) -> (i32, i32) {
    %c0_i32 = arith.constant 0 : i32
    %c0_i32_0 = arith.constant 0 : i32
    return %arg0, %c0_i32 : i32, i32
  }
}

</mosaic_0001>

<bundles_post_ra>
// kernel: tpu_custom_call.1
= control target key start
LH: loop header
LB: loop body
LE: loop exit
PB: predicated region body
PF: predicated region fallthrough
CT: control target
= control target key end

     0   :  { %s1585_s24 = smov 0   ;;  %s1896_s0 = inlined_call_operand.vmem [shape: f32[512,16], index: 0, kind: input, shape index: {}]   ;;  %s1897_s1 = inlined_call_operand.vmem [shape: bf16[16,128], index: 1, kind: input, shape index: {}]   ;;  %s1898_s2 = inlined_call_operand.vmem [shape: f32[1,128], index: 2, kind: input, shape index: {}]   ;;  %s1899_s3 = inlined_call_operand.vmem [shape: bf16[128,128], index: 3, kind: input, shape index: {}]   ;;  %s1900_s4 = inlined_call_operand.vmem [shape: f32[1,128], index: 4, kind: input, shape index: {}]   ;;  %s1901_s5 = inlined_call_operand.vmem [shape: bf16[128,16], index: 5, kind: input, shape index: {}]   ;;  %s1902_s6 = inlined_call_operand.vmem [shape: f32[1,16], index: 6, kind: input, shape index: {}]   ;;  %s1903_s7 = inlined_call_operand.vmem [shape: f32[512,16], index: 7, kind: output, shape index: {}]  }
   0x1 LB: > { %s1268_s25 = sadd.s32 4294967295, %s1543_s24   ;;  %p1272_p0 = scmp.ge.s32.totalorder %s1543_s24, 1  ;;  %s1543_s24 = sphi %s1585_s24, %s17_s24  }
   0x2   : > { %p238_p1 = scmp.lt.s32.totalorder %s1543_s24, 3 }
   0x4   : > { %p239_p2 = pnand %p1272_p0, %p238_p1 }
   0x5   : > { %v1520_v0 = vld [vmem:[%s1897_s1] sm:$0xff] (!%p239_p2)   ;;  %s1273_s28 = sshll.u32 (!%p239_p2), %s1268_s25, 5  ;;  %vm346_vm0 = vcmask (!%p239_p2), 130048   ;;  %v1522_v23 = vld [vmem:[%s1899_s3 + $0x8] sm:$0xff] (!%p239_p2)   ;;  %v1523_v29 = vld [vmem:[%s1899_s3 + $0x10] sm:$0xff] (!%p239_p2)  }
   0x6   : > { %242 = sbr.rel (%p239_p2) target bundleno = 742 (0x2e6), region = 48  ;;  %p271_p3 = scmp.lt.s32.totalorder (!%p239_p2), %s1273_s28, 63  ;;  %1380 = vmatprep.subr.bf16.mxu0 (!%p239_p2), %v1520_v0  ;;  %1510 = vmatprep.subr.bf16.mxu1 (!%p239_p2), %v1520_v0  ;;  %v1521_v1 = vld [vmem:[%s1899_s3] sm:$0xff] (!%p239_p2)   ;;  %v1524_v37 = vld [vmem:[%s1899_s3 + $0x18] sm:$0xff] (!%p239_p2)   ;;  %v1526_v54 = vld [vmem:[%s1899_s3 + $0x28] sm:$0xff] (!%p239_p2)  }
   0x7   : > { %1381 = vmatpush3.bf16.msra.mxu0 (!%p239_p2), %v1520_v0  ;;  %1511 = vmatpush3.bf16.msra.mxu1 (!%p239_p2), %v1520_v0  ;;  %v1525_v45 = vld [vmem:[%s1899_s3 + $0x20] sm:$0xff] (!%p239_p2)   ;;  %v1527_v55 = vld [vmem:[%s1899_s3 + $0x30] sm:$0xff] (!%p239_p2)   ;;  %v1528_v56 = vld [vmem:[%s1899_s3 + $0x38] sm:$0xff] (!%p239_p2)  }
   0x8   : > { %1414 = vmatprep.subr.bf16.mxu1 (!%p239_p2), %v1521_v1  ;;  %v1529_v57 = vld [vmem:[%s1901_s5] sm:$0xff] (!%p239_p2)   ;;  %v1530_v58 = vld [vmem:[%s1901_s5 + $0x8] sm:$0xff] (!%p239_p2)   ;;  %v1531_v59 = vld [vmem:[%s1901_s5 + $0x10] sm:$0xff] (!%p239_p2)  }
   0x9   : > { %1462 = vmatprep.subr.bf16.mxu0 (!%p239_p2), %v1529_v57  ;;  %v1532_v60 = vld [vmem:[%s1901_s5 + $0x18] sm:$0xff] (!%p239_p2)   ;;  %v1533_v61 = vld [vmem:[%s1901_s5 + $0x20] sm:$0xff] (!%p239_p2)  }
   0xa   : > { %v1696_v62 = vld [vmem:[%s1898_s2] ss:$0 sm:$0xff] (!%p239_p2) }
   0xd   : > { %s1905_s28 = smov (!%p271_p3, %s1273_s28), 63 }
   0xe   : > { %s1274_s8 = sshll.u32 %s1905_s28, 3 }
   0xf   : > { %s1607_s11 = scalar_lea.vmem %s1896_s0, %s1274_s8  ;;  %s1795_s10 = scalar_lea.vmem %s1903_s7, %s1274_s8 }
  0x10   : > { %v283_v2 = vld [vmem:[%s1607_s11] sm:$0xff]  ;;  %v284_v3 = vld [vmem:[%s1607_s11 + $0x8] sm:$0xff]  ;;  %v285_v4 = vld [vmem:[%s1607_s11 + $0x10] sm:$0xff] }
  0x11   : > { %v315_v5 = vpack.c.bf16 %v284_v3, %v283_v2  ;;  %v286_v6 = vld [vmem:[%s1607_s11 + $0x18] sm:$0xff]  ;;  %v287_v7 = vld [vmem:[%s1607_s11 + $0x20] sm:$0xff]  ;;  %v288_v8 = vld [vmem:[%s1607_s11 + $0x28] sm:$0xff] }
  0x12   : > { %v316_v9 = vpack.c.bf16 %v286_v6, %v285_v4  ;;  %v317_v10 = vpack.c.bf16 %v288_v8, %v287_v7  ;;  %v289_v11 = vld [vmem:[%s1607_s11 + $0x30] sm:$0xff]  ;;  %v290_v12 = vld [vmem:[%s1607_s11 + $0x38] sm:$0xff]  ;;  %v291_v13 = vld [vmem:[%s1607_s11 + $0x40] sm:$0xff] }
  0x13   : > { %1382 = vmatprep.mubr.msk.bf16.mxu0 %vm346_vm0, %v315_v5  ;;  %v292_v14 = vld [vmem:[%s1607_s11 + $0x48] sm:$0xff]  ;;  %v299_v15 = vld [vmem:[%s1607_s11 + $0x80] sm:$0xff]  ;;  %v301_v18 = vld [vmem:[%s1607_s11 + $0x90] sm:$0xff]  ;;  %v318_v24 = vpack.c.bf16 %v290_v12, %v289_v11 }
  0x14   : > { %1383 = vmatmul.mubr.msk.bf16.vlgmr.msra.gmra.mrb[0].mxu0 %vm346_vm0, %v316_v9  ;;  %v300_v16 = vld [vmem:[%s1607_s11 + $0x88] sm:$0xff]  ;;  %v302_v19 = vld [vmem:[%s1607_s11 + $0x98] sm:$0xff]  ;;  %v303_v20 = vld [vmem:[%s1607_s11 + $0xa0] sm:$0xff]  ;;  %v319_v26 = vpack.c.bf16 %v292_v14, %v291_v13 }
  0x15   : > { %1386 = vmatprep.mubr.msk.bf16.mxu0 %vm346_vm0, %v317_v10  ;;  %v323_v17 = vpack.c.bf16 %v300_v16, %v299_v15  ;;  %v324_v21 = vpack.c.bf16 %v302_v19, %v301_v18  ;;  %v304_v22 = vld [vmem:[%s1607_s11 + $0xa8] sm:$0xff]  ;;  %v305_v27 = vld [vmem:[%s1607_s11 + $0xb0] sm:$0xff]  ;;  %v306_v28 = vld [vmem:[%s1607_s11 + $0xb8] sm:$0xff]  ;;  %1463 = vmatpush3.bf16.msra.mxu0 %v1529_v57 }
  0x16   : > { %v325_v25 = vpack.c.bf16 %v304_v22, %v303_v20  ;;  %v307_v30 = vld [vmem:[%s1607_s11 + $0xc0] sm:$0xff]  ;;  %v308_v31 = vld [vmem:[%s1607_s11 + $0xc8] sm:$0xff]  ;;  %v293_v32 = vld [vmem:[%s1607_s11 + $0x50] sm:$0xff]  ;;  %v326_v36 = vpack.c.bf16 %v306_v28, %v305_v27  ;;  %1464 = vmatprep.subr.bf16.mxu0 %v1530_v58 }
  0x17   : > { %1398 = vmatprep.mubr.msk.bf16.mxu1 %vm346_vm0, %v323_v17  ;;  %v294_v33 = vld [vmem:[%s1607_s11 + $0x58] sm:$0xff]  ;;  %v295_v34 = vld [vmem:[%s1607_s11 + $0x60] sm:$0xff]  ;;  %v296_v35 = vld [vmem:[%s1607_s11 + $0x68] sm:$0xff]  ;;  %v327_v38 = vpack.c.bf16 %v308_v31, %v307_v30 }
  0x18   : > { %1399 = vmatmul.mubr.msk.bf16.vlgmr.msra.gmra.mrb[0].mxu1 %vm346_vm0, %v324_v21  ;;  %v320_v39 = vpack.c.bf16 %v294_v33, %v293_v32  ;;  %v321_v40 = vpack.c.bf16 %v296_v35, %v295_v34  ;;  %v309_v41 = vld [vmem:[%s1607_s11 + $0xd0] sm:$0xff]  ;;  %v310_v42 = vld [vmem:[%s1607_s11 + $0xd8] sm:$0xff]  ;;  %v311_v43 = vld [vmem:[%s1607_s11 + $0xe0] sm:$0xff] }
  0x19   : > { %1402 = vmatprep.mubr.msk.bf16.mxu1 %vm346_vm0, %v325_v25  ;;  %1415 = vmatpush3.bf16.msra.mxu1 %v1521_v1  ;;  %v312_v44 = vld [vmem:[%s1607_s11 + $0xe8] sm:$0xff]  ;;  %v297_v46 = vld [vmem:[%s1607_s11 + $0x70] sm:$0xff]  ;;  %v298_v47 = vld [vmem:[%s1607_s11 + $0x78] sm:$0xff]  ;;  %v328_v48 = vpack.c.bf16 %v310_v42, %v309_v41 }
  0x1a   : > { %1416 = vmatprep.subr.bf16.mxu1 %v1522_v23  ;;  %v329_v49 = vpack.c.bf16 %v312_v44, %v311_v43  ;;  %v322_v50 = vpack.c.bf16 %v298_v47, %v297_v46  ;;  %v313_v51 = vld [vmem:[%s1607_s11 + $0xf0] sm:$0xff]  ;;  %v314_v52 = vld [vmem:[%s1607_s11 + $0xf8] sm:$0xff]  ;;  %1465 = vmatpush3.bf16.msra.mxu0 %v1530_v58 }
  0x1b   : > { %v330_v53 = vpack.c.bf16 %v314_v52, %v313_v51  ;;  %1466 = vmatprep.subr.bf16.mxu0 %v1531_v59 }
  0x1c   : > { %1387 = vmatmul.mubr.msk.bf16.gmra.mrb[4].mxu0 %vm346_vm0, %v318_v24 }
  0x1d   : > { %1390 = vmatprep.mubr.msk.bf16.mxu0 %vm346_vm0, %v319_v26  ;;  %1417 = vmatpush3.bf16.msra.mxu1 %v1522_v23 }
  0x1e   : > { %1418 = vmatprep.subr.bf16.mxu1 %v1523_v29  ;;  %1467 = vmatpush3.bf16.msra.mxu0 %v1531_v59 }
  0x1f   : > { %1468 = vmatprep.subr.bf16.mxu0 %v1532_v60 }
  0x20   : > { %1403 = vmatmul.mubr.msk.bf16.gmra.mrb[4].mxu1 %vm346_vm0, %v326_v36 }
  0x21   : > { %1406 = vmatprep.mubr.msk.bf16.mxu1 %vm346_vm0, %v327_v38  ;;  %1419 = vmatpush3.bf16.msra.mxu1 %v1523_v29 }
  0x22   : > { %1420 = vmatprep.subr.bf16.mxu1 %v1524_v37  ;;  %1469 = vmatpush3.bf16.msra.mxu0 %v1532_v60 }
  0x23   : > { %1470 = vmatprep.subr.bf16.mxu0 %v1533_v61 }
  0x24   : > { %1391 = vmatmul.mubr.msk.bf16.gmra.mrb[8].mxu0 %vm346_vm0, %v320_v39 }
  0x25   : > { %1394 = vmatprep.mubr.msk.bf16.mxu0 %vm346_vm0, %v321_v40  ;;  %1421 = vmatpush3.bf16.msra.mxu1 %v1524_v37 }
  0x26   : > { %1422 = vmatprep.subr.bf16.mxu1 %v1525_v45  ;;  %1471 = vmatpush3.bf16.msra.mxu0 %v1533_v61 }
  0x28   : > { %1407 = vmatmul.mubr.msk.bf16.gmra.mrb[8].mxu1 %vm346_vm0, %v328_v48 }
  0x29   : > { %1410 = vmatprep.mubr.msk.bf16.mxu1 %vm346_vm0, %v329_v49  ;;  %1423 = vmatpush3.bf16.msra.mxu1 %v1525_v45 }
  0x2a   : > { %1424 = vmatprep.subr.bf16.mxu1 %v1526_v54 }
  0x2c   : > { %1395 = vmatmul.mubr.msk.bf16.gmra.mrb[12].mxu0 %vm346_vm0, %v322_v50 }
  0x2d   : > { %1425 = vmatpush3.bf16.msra.mxu1 %v1526_v54 }
  0x2e   : > { %1426 = vmatprep.subr.bf16.mxu1 %v1527_v55 }
  0x30   : > { %1411 = vmatmul.mubr.msk.bf16.gmra.mrb[12].mxu1 %vm346_vm0, %v330_v53 }
  0x31   : > { %1427 = vmatpush3.bf16.msra.mxu1 %v1527_v55 }
  0x32   : > { %1428 = vmatprep.subr.bf16.mxu1 %v1528_v56 }
  0x35   : > { %1429 = vmatpush3.bf16.msra.mxu1 %v1528_v56 }
  0xe7   : > { %v1384_v63 = vpop.f32.mrb[0].mxu0 }
  0xe8   : > { %v438_v0 = vadd.f32 %v1384_v63, %v1696_v62  ;;  %v429_v1 = vpop.f32.mrb[1].mxu0 }
  0xe9   : > { %v430_v2 = vadd.f32 %v1696_v62, %v429_v1  ;;  %v1385_v3 = vpop.f32.mrb[2].mxu0 }
  0xea   : > { %v558_v4 = vmul.f32 0.2, %v438_v0  ;;  %v441_v5 = vadd.f32 %v1385_v3, %v1696_v62  ;;  %v432_v6 = vpop.f32.mrb[3].mxu0 }
  0xeb   : > { %v556_v7 = vmul.f32 0.2, %v430_v2  ;;  %v433_v8 = vadd.f32 %v1696_v62, %v432_v6  ;;  %v1400_v10 = vpop.f32.mrb[0].mxu1 }
  0xec   : > { %v559_v9 = vmul.f32 0.2, %v441_v5  ;;  %v502_v12 = vadd.f32 %v1400_v10, %v1696_v62  ;;  %v493_v13 = vpop.f32.mrb[1].mxu1  ;;  %v590_v14 = vmax.f32 %v438_v0, %v558_v4 }
  0xed   : > { %v557_v11 = vmul.f32 0.2, %v433_v8  ;;  %v494_v16 = vadd.f32 %v1696_v62, %v493_v13  ;;  %v1401_v17 = vpop.f32.mrb[2].mxu1  ;;  %v588_v18 = vmax.f32 %v430_v2, %v556_v7 }
  0xee   : > { %v591_v15 = vmax.f32 %v441_v5, %v559_v9  ;;  %v574_v21 = vmul.f32 0.2, %v502_v12  ;;  %v505_v22 = vadd.f32 %v1401_v17, %v1696_v62  ;;  %v496_v23 = vpop.f32.mrb[3].mxu1 }
  0xef   : > { %v589_v19 = vmax.f32 %v433_v8, %v557_v11  ;;  %v1388_v20 = vpop.f32.mrb[4].mxu0  ;;  %v572_v27 = vmul.f32 0.2, %v494_v16  ;;  %v497_v28 = vadd.f32 %v1696_v62, %v496_v23 }
  0xf0   : > { %v621_v24 = vpack.c.bf16 %v591_v15, %v590_v14  ;;  %v454_v25 = vadd.f32 %v1388_v20, %v1696_v62  ;;  %v445_v26 = vpop.f32.mrb[5].mxu0  ;;  %v606_v32 = vmax.f32 %v502_v12, %v574_v21  ;;  %v575_v33 = vmul.f32 0.2, %v505_v22 }
  0xf1   : > { %v446_v29 = vadd.f32 %v1696_v62, %v445_v26  ;;  %v1389_v30 = vpop.f32.mrb[6].mxu0  ;;  %v620_v31 = vpack.c.bf16 %v589_v19, %v588_v18  ;;  %v604_v37 = vmax.f32 %v494_v16, %v572_v27  ;;  %v573_v38 = vmul.f32 0.2, %v497_v28 }
  0xf2   : > { %v562_v34 = vmul.f32 0.2, %v454_v25  ;;  %v457_v35 = vadd.f32 %v1389_v30, %v1696_v62  ;;  %v448_v36 = vpop.f32.mrb[7].mxu0  ;;  %v607_v41 = vmax.f32 %v505_v22, %v575_v33 }
  0xf3   : > { %v560_v39 = vmul.f32 0.2, %v446_v29  ;;  %v449_v40 = vadd.f32 %v1696_v62, %v448_v36  ;;  %1430 = vmatprep.mubr.bf16.mxu1 %v620_v31  ;;  %v605_v43 = vmax.f32 %v497_v28, %v573_v38  ;;  %v1404_v44 = vpop.f32.mrb[4].mxu1 }
  0xf4   : > { %v563_v42 = vmul.f32 0.2, %v457_v35  ;;  %1431 = vmatmul.mubr.bf16.vlgmr.msra.gmra.mrb[16].mxu1 %v621_v24  ;;  %v518_v46 = vadd.f32 %v1404_v44, %v1696_v62  ;;  %v509_v47 = vpop.f32.mrb[5].mxu1  ;;  %v1711_v48 = vpack.c.bf16 %v607_v41, %v606_v32  ;;  %v594_v49 = vmax.f32 %v454_v25, %v562_v34 }
  0xf5   : > { %v561_v45 = vmul.f32 0.2, %v449_v40  ;;  %v510_v51 = vadd.f32 %v1696_v62, %v509_v47  ;;  %v1405_v52 = vpop.f32.mrb[6].mxu1  ;;  %v1714_v53 = vpack.c.bf16 %v605_v43, %v604_v37  ;;  %v592_v54 = vmax.f32 %v446_v29, %v560_v39 }
  0xf6   : > { %v595_v50 = vmax.f32 %v457_v35, %v563_v42  ;;  %v578_v57 = vmul.f32 0.2, %v518_v46  ;;  %v521_v58 = vadd.f32 %v1405_v52, %v1696_v62  ;;  %v512_v59 = vpop.f32.mrb[7].mxu1 }
  0xf7   : > { %v593_v55 = vmax.f32 %v449_v40, %v561_v45  ;;  %v1392_v56 = vpop.f32.mrb[8].mxu0  ;;  %v576_v0 = vmul.f32 0.2, %v510_v51  ;;  %v513_v1 = vadd.f32 %v1696_v62, %v512_v59 }
  0xf8   : > { %v470_v60 = vadd.f32 %v1392_v56, %v1696_v62  ;;  %v461_v61 = vpop.f32.mrb[9].mxu0  ;;  %v623_v63 = vpack.c.bf16 %v595_v50, %v594_v49  ;;  %v610_v5 = vmax.f32 %v518_v46, %v578_v57  ;;  %v579_v6 = vmul.f32 0.2, %v521_v58 }
  0xf9   : > { %v462_v2 = vadd.f32 %v1696_v62, %v461_v61  ;;  %v1393_v3 = vpop.f32.mrb[10].mxu0  ;;  %v622_v4 = vpack.c.bf16 %v593_v55, %v592_v54  ;;  %v608_v10 = vmax.f32 %v510_v51, %v576_v0  ;;  %v577_v11 = vmul.f32 0.2, %v513_v1 }
  0xfa   : > { %v566_v7 = vmul.f32 0.2, %v470_v60  ;;  %v473_v8 = vadd.f32 %v1393_v3, %v1696_v62  ;;  %v464_v9 = vpop.f32.mrb[11].mxu0  ;;  %v611_v14 = vmax.f32 %v521_v58, %v579_v6 }
  0xfb   : > { %v564_v12 = vmul.f32 0.2, %v462_v2  ;;  %v465_v13 = vadd.f32 %v1696_v62, %v464_v9  ;;  %1434 = vmatprep.mubr.bf16.mxu1 %v622_v4  ;;  %v609_v16 = vmax.f32 %v513_v1, %v577_v11  ;;  %v1408_v17 = vpop.f32.mrb[8].mxu1 }
  0xfc   : > { %v567_v15 = vmul.f32 0.2, %v473_v8  ;;  %1435 = vmatmul.mubr.bf16.gmra.mrb[20].mxu1 %v623_v63  ;;  %v534_v19 = vadd.f32 %v1408_v17, %v1696_v62  ;;  %v525_v20 = vpop.f32.mrb[9].mxu1  ;;  %v1723_v21 = vpack.c.bf16 %v611_v14, %v610_v5  ;;  %v598_v22 = vmax.f32 %v470_v60, %v566_v7 }
  0xfd   : > { %v565_v18 = vmul.f32 0.2, %v465_v13  ;;  %v526_v24 = vadd.f32 %v1696_v62, %v525_v20  ;;  %v1409_v25 = vpop.f32.mrb[10].mxu1  ;;  %v630_v26 = vpack.c.bf16 %v609_v16, %v608_v10  ;;  %v596_v27 = vmax.f32 %v462_v2, %v564_v12 }
  0xfe   : > { %v599_v23 = vmax.f32 %v473_v8, %v567_v15  ;;  %v582_v30 = vmul.f32 0.2, %v534_v19  ;;  %v537_v31 = vadd.f32 %v1409_v25, %v1696_v62  ;;  %v528_v32 = vpop.f32.mrb[11].mxu1 }
  0xff   : > { %v597_v28 = vmax.f32 %v465_v13, %v565_v18  ;;  %v1396_v29 = vpop.f32.mrb[12].mxu0  ;;  %v580_v36 = vmul.f32 0.2, %v526_v24  ;;  %v529_v37 = vadd.f32 %v1696_v62, %v528_v32 }
 0x100   : > { %v486_v33 = vadd.f32 %v1396_v29, %v1696_v62  ;;  %v477_v34 = vpop.f32.mrb[13].mxu0  ;;  %v625_v35 = vpack.c.bf16 %v599_v23, %v598_v22  ;;  %v614_v41 = vmax.f32 %v534_v19, %v582_v30  ;;  %v583_v42 = vmul.f32 0.2, %v537_v31  ;;  %v1751_v19 = vld [vmem:[%s1900_s4] ss:$0 sm:$0xff] }
 0x101   : > { %v478_v38 = vadd.f32 %v1696_v62, %v477_v34  ;;  %v1397_v39 = vpop.f32.mrb[14].mxu0  ;;  %v624_v40 = vpack.c.bf16 %v597_v28, %v596_v27  ;;  %v612_v46 = vmax.f32 %v526_v24, %v580_v36  ;;  %v581_v47 = vmul.f32 0.2, %v529_v37 }
 0x102   : > { %v570_v43 = vmul.f32 0.2, %v486_v33  ;;  %v489_v44 = vadd.f32 %v1397_v39, %v1696_v62  ;;  %v480_v45 = vpop.f32.mrb[15].mxu0  ;;  %v615_v51 = vmax.f32 %v537_v31, %v583_v42 }
 0x103   : > { %v568_v49 = vmul.f32 0.2, %v478_v38  ;;  %v481_v50 = vadd.f32 %v1696_v62, %v480_v45  ;;  %1438 = vmatprep.mubr.bf16.mxu1 %v624_v40  ;;  %v613_v54 = vmax.f32 %v529_v37, %v581_v47  ;;  %v1412_v55 = vpop.f32.mrb[12].mxu1 }
 0x104   : > { %v571_v52 = vmul.f32 0.2, %v489_v44  ;;  %1439 = vmatmul.mubr.bf16.gmra.mrb[24].mxu1 %v625_v35  ;;  %v550_v57 = vadd.f32 %v1412_v55, %v1696_v62  ;;  %v541_v58 = vpop.f32.mrb[13].mxu1  ;;  %v633_v59 = vpack.c.bf16 %v615_v51, %v614_v41  ;;  %v602_v60 = vmax.f32 %v486_v33, %v570_v43 }
 0x105   : > { %v569_v56 = vmul.f32 0.2, %v481_v50  ;;  %v542_v63 = vadd.f32 %v1696_v62, %v541_v58  ;;  %v1413_v0 = vpop.f32.mrb[14].mxu1  ;;  %v632_v1 = vpack.c.bf16 %v613_v54, %v612_v46  ;;  %v600_v2 = vmax.f32 %v478_v38, %v568_v49 }
 0x106   : > { %v603_v61 = vmax.f32 %v489_v44, %v571_v52  ;;  %v586_v4 = vmul.f32 0.2, %v550_v57  ;;  %v553_v5 = vadd.f32 %v1413_v0, %v1696_v62  ;;  %v544_v6 = vpop.f32.mrb[15].mxu1 }
 0x107   : > { %v601_v3 = vmax.f32 %v481_v50, %v569_v56  ;;  %v584_v8 = vmul.f32 0.2, %v542_v63  ;;  %v545_v9 = vadd.f32 %v1696_v62, %v544_v6  ;;  %v1534_v62 = vld [vmem:[%s1901_s5 + $0x28] sm:$0xff]  }
 0x108   : > { %v627_v7 = vpack.c.bf16 %v603_v61, %v602_v60  ;;  %v618_v11 = vmax.f32 %v550_v57, %v586_v4  ;;  %v587_v12 = vmul.f32 0.2, %v553_v5  ;;  %1472 = vmatprep.subr.bf16.mxu0 %v1534_v62 }
 0x109   : > { %v626_v10 = vpack.c.bf16 %v601_v3, %v600_v2  ;;  %v616_v13 = vmax.f32 %v542_v63, %v584_v8  ;;  %v585_v14 = vmul.f32 0.2, %v545_v9  ;;  %1473 = vmatpush3.bf16.msra.mxu0 %v1534_v62 }
 0x10a   : > { %v619_v15 = vmax.f32 %v553_v5, %v587_v12 }
 0x10b   : > { %1442 = vmatprep.mubr.bf16.mxu1 %v626_v10  ;;  %v617_v16 = vmax.f32 %v545_v9, %v585_v14 }
 0x10c   : > { %1443 = vmatmul.mubr.bf16.gmra.mrb[28].mxu1 %v627_v7  ;;  %v635_v17 = vpack.c.bf16 %v619_v15, %v618_v11 }
 0x10d   : > { %1446 = vmatprep.mubr.bf16.mxu1 %v1714_v53  ;;  %v634_v18 = vpack.c.bf16 %v617_v16, %v616_v13  ;;  %v1535_v53 = vld [vmem:[%s1901_s5 + $0x30] sm:$0xff]  }
 0x10e   : > { %1474 = vmatprep.subr.bf16.mxu0 %v1535_v53 }
 0x10f   : > { %1475 = vmatpush3.bf16.msra.mxu0 %v1535_v53 }
 0x114   : > { %1447 = vmatmul.mubr.bf16.gmra.mrb[32].mxu1 %v1711_v48  ;;  %v1536_v48 = vld [vmem:[%s1901_s5 + $0x38] sm:$0xff]  }
 0x115   : > { %1450 = vmatprep.mubr.bf16.mxu1 %v630_v26  ;;  %1476 = vmatprep.subr.bf16.mxu0 %v1536_v48 }
 0x116   : > { %1477 = vmatpush3.bf16.msra.mxu0 %v1536_v48 }
 0x11c   : > { %1451 = vmatmul.mubr.bf16.gmra.mrb[36].mxu1 %v1723_v21 }
 0x11d   : > { %1454 = vmatprep.mubr.bf16.mxu1 %v632_v1 }
 0x124   : > { %1455 = vmatmul.mubr.bf16.gmra.mrb[40].mxu1 %v633_v59 }
 0x125   : > { %1458 = vmatprep.mubr.bf16.mxu1 %v634_v18 }
 0x12c   : > { %1459 = vmatmul.mubr.bf16.gmra.mrb[44].mxu1 %v635_v17 }
 0x1c7   : > { %v1432_v20 = vpop.f32.mrb[16].mxu1 }
 0x1c8   : > { %v750_v21 = vadd.f32 %v1432_v20, %v1751_v19  ;;  %v741_v22 = vpop.f32.mrb[17].mxu1 }
 0x1c9   : > { %v742_v23 = vadd.f32 %v1751_v19, %v741_v22  ;;  %v1433_v24 = vpop.f32.mrb[18].mxu1 }
 0x1ca   : > { %v870_v25 = vmul.f32 0.2, %v750_v21  ;;  %v753_v26 = vadd.f32 %v1433_v24, %v1751_v19  ;;  %v744_v27 = vpop.f32.mrb[19].mxu1 }
 0x1cb   : > { %v868_v28 = vmul.f32 0.2, %v742_v23  ;;  %v745_v29 = vadd.f32 %v1751_v19, %v744_v27 }
 0x1cc   : > { %v871_v30 = vmul.f32 0.2, %v753_v26  ;;  %v902_v32 = vmax.f32 %v750_v21, %v870_v25 }
 0x1cd   : > { %v869_v31 = vmul.f32 0.2, %v745_v29  ;;  %v900_v34 = vmax.f32 %v742_v23, %v868_v28 }
 0x1ce   : > { %v903_v33 = vmax.f32 %v753_v26, %v871_v30 }
 0x1cf   : > { %v901_v35 = vmax.f32 %v745_v29, %v869_v31  ;;  %v1436_v36 = vpop.f32.mrb[20].mxu1 }
 0x1d0   : > { %v933_v37 = vpack.c.bf16 %v903_v33, %v902_v32  ;;  %v766_v38 = vadd.f32 %v1436_v36, %v1751_v19  ;;  %v757_v39 = vpop.f32.mrb[21].mxu1 }
 0x1d1   : > { %v758_v40 = vadd.f32 %v1751_v19, %v757_v39  ;;  %v1437_v41 = vpop.f32.mrb[22].mxu1  ;;  %v932_v42 = vpack.c.bf16 %v901_v35, %v900_v34 }
 0x1d2   : > { %v874_v43 = vmul.f32 0.2, %v766_v38  ;;  %v769_v44 = vadd.f32 %v1437_v41, %v1751_v19  ;;  %v760_v45 = vpop.f32.mrb[23].mxu1 }
 0x1d3   : > { %v872_v46 = vmul.f32 0.2, %v758_v40  ;;  %v761_v47 = vadd.f32 %v1751_v19, %v760_v45  ;;  %1478 = vmatprep.mubr.bf16.mxu0 %v932_v42 }
 0x1d4   : > { %v875_v49 = vmul.f32 0.2, %v769_v44  ;;  %1479 = vmatmul.mubr.bf16.vlgmr.msra.gmra.mrb[16].mxu0 %v933_v37  ;;  %v906_v51 = vmax.f32 %v766_v38, %v874_v43 }
 0x1d5   : > { %v873_v50 = vmul.f32 0.2, %v761_v47  ;;  %v904_v54 = vmax.f32 %v758_v40, %v872_v46 }
 0x1d6   : > { %v907_v52 = vmax.f32 %v769_v44, %v875_v49 }
 0x1d7   : > { %v905_v55 = vmax.f32 %v761_v47, %v873_v50  ;;  %v1440_v56 = vpop.f32.mrb[24].mxu1 }
 0x1d8   : > { %v782_v57 = vadd.f32 %v1440_v56, %v1751_v19  ;;  %v773_v58 = vpop.f32.mrb[25].mxu1  ;;  %v935_v59 = vpack.c.bf16 %v907_v52, %v906_v51 }
 0x1d9   : > { %v774_v60 = vadd.f32 %v1751_v19, %v773_v58  ;;  %v1441_v61 = vpop.f32.mrb[26].mxu1  ;;  %v934_v63 = vpack.c.bf16 %v905_v55, %v904_v54 }
 0x1da   : > { %v878_v0 = vmul.f32 0.2, %v782_v57  ;;  %v785_v1 = vadd.f32 %v1441_v61, %v1751_v19  ;;  %v776_v2 = vpop.f32.mrb[27].mxu1 }
 0x1db   : > { %v876_v3 = vmul.f32 0.2, %v774_v60  ;;  %v777_v4 = vadd.f32 %v1751_v19, %v776_v2  ;;  %1482 = vmatprep.mubr.bf16.mxu0 %v934_v63 }
 0x1dc   : > { %v879_v5 = vmul.f32 0.2, %v785_v1  ;;  %1483 = vmatmul.mubr.bf16.gmra.mrb[20].mxu0 %v935_v59  ;;  %v910_v7 = vmax.f32 %v782_v57, %v878_v0 }
 0x1dd   : > { %v877_v6 = vmul.f32 0.2, %v777_v4  ;;  %v908_v9 = vmax.f32 %v774_v60, %v876_v3 }
 0x1de   : > { %v911_v8 = vmax.f32 %v785_v1, %v879_v5 }
 0x1df   : > { %v909_v10 = vmax.f32 %v777_v4, %v877_v6  ;;  %v1444_v11 = vpop.f32.mrb[28].mxu1 }
 0x1e0   : > { %v798_v12 = vadd.f32 %v1444_v11, %v1751_v19  ;;  %v789_v13 = vpop.f32.mrb[29].mxu1  ;;  %v937_v14 = vpack.c.bf16 %v911_v8, %v910_v7 }
 0x1e1   : > { %v790_v15 = vadd.f32 %v1751_v19, %v789_v13  ;;  %v1445_v16 = vpop.f32.mrb[30].mxu1  ;;  %v936_v17 = vpack.c.bf16 %v909_v10, %v908_v9 }
 0x1e2   : > { %v882_v18 = vmul.f32 0.2, %v798_v12  ;;  %v801_v62 = vadd.f32 %v1445_v16, %v1751_v19  ;;  %v792_v53 = vpop.f32.mrb[31].mxu1 }
 0x1e3   : > { %v880_v48 = vmul.f32 0.2, %v790_v15  ;;  %v793_v20 = vadd.f32 %v1751_v19, %v792_v53  ;;  %1486 = vmatprep.mubr.bf16.mxu0 %v936_v17 }
 0x1e4   : > { %v883_v21 = vmul.f32 0.2, %v801_v62  ;;  %1487 = vmatmul.mubr.bf16.gmra.mrb[24].mxu0 %v937_v14  ;;  %v914_v23 = vmax.f32 %v798_v12, %v882_v18 }
 0x1e5   : > { %v881_v22 = vmul.f32 0.2, %v793_v20  ;;  %v912_v25 = vmax.f32 %v790_v15, %v880_v48 }
 0x1e6   : > { %v915_v24 = vmax.f32 %v801_v62, %v883_v21 }
 0x1e7   : > { %v913_v26 = vmax.f32 %v793_v20, %v881_v22  ;;  %v1448_v27 = vpop.f32.mrb[32].mxu1 }
 0x1e8   : > { %v814_v28 = vadd.f32 %v1448_v27, %v1751_v19  ;;  %v805_v29 = vpop.f32.mrb[33].mxu1  ;;  %v939_v30 = vpack.c.bf16 %v915_v24, %v914_v23 }
 0x1e9   : > { %v806_v31 = vadd.f32 %v1751_v19, %v805_v29  ;;  %v1449_v32 = vpop.f32.mrb[34].mxu1  ;;  %v938_v33 = vpack.c.bf16 %v913_v26, %v912_v25 }
 0x1ea   : > { %v886_v34 = vmul.f32 0.2, %v814_v28  ;;  %v817_v35 = vadd.f32 %v1449_v32, %v1751_v19  ;;  %v808_v36 = vpop.f32.mrb[35].mxu1 }
 0x1eb   : > { %v884_v37 = vmul.f32 0.2, %v806_v31  ;;  %v809_v38 = vadd.f32 %v1751_v19, %v808_v36  ;;  %1490 = vmatprep.mubr.bf16.mxu0 %v938_v33 }
 0x1ec   : > { %v887_v39 = vmul.f32 0.2, %v817_v35  ;;  %1491 = vmatmul.mubr.bf16.gmra.mrb[28].mxu0 %v939_v30  ;;  %v918_v41 = vmax.f32 %v814_v28, %v886_v34 }
 0x1ed   : > { %v885_v40 = vmul.f32 0.2, %v809_v38  ;;  %v916_v43 = vmax.f32 %v806_v31, %v884_v37 }
 0x1ee   : > { %v919_v42 = vmax.f32 %v817_v35, %v887_v39 }
 0x1ef   : > { %v917_v44 = vmax.f32 %v809_v38, %v885_v40  ;;  %v1452_v45 = vpop.f32.mrb[36].mxu1  ;;  %v1788_v38 = vld [vmem:[%s1902_s6] ss:$0 sm:$0xff] }
 0x1f0   : > { %v830_v46 = vadd.f32 %v1452_v45, %v1751_v19  ;;  %v821_v47 = vpop.f32.mrb[37].mxu1  ;;  %v941_v49 = vpack.c.bf16 %v919_v42, %v918_v41 }
 0x1f1   : > { %v822_v50 = vadd.f32 %v1751_v19, %v821_v47  ;;  %v1453_v51 = vpop.f32.mrb[38].mxu1  ;;  %v940_v52 = vpack.c.bf16 %v917_v44, %v916_v43 }
 0x1f2   : > { %v890_v54 = vmul.f32 0.2, %v830_v46  ;;  %v833_v55 = vadd.f32 %v1453_v51, %v1751_v19  ;;  %v824_v56 = vpop.f32.mrb[39].mxu1 }
 0x1f3   : > { %v888_v57 = vmul.f32 0.2, %v822_v50  ;;  %v825_v58 = vadd.f32 %v1751_v19, %v824_v56  ;;  %1494 = vmatprep.mubr.bf16.mxu0 %v940_v52 }
 0x1f4   : > { %v891_v59 = vmul.f32 0.2, %v833_v55  ;;  %1495 = vmatmul.mubr.bf16.gmra.mrb[32].mxu0 %v941_v49  ;;  %v922_v61 = vmax.f32 %v830_v46, %v890_v54 }
 0x1f5   : > { %v889_v60 = vmul.f32 0.2, %v825_v58  ;;  %v920_v0 = vmax.f32 %v822_v50, %v888_v57 }
 0x1f6   : > { %v923_v63 = vmax.f32 %v833_v55, %v891_v59 }
 0x1f7   : > { %v921_v1 = vmax.f32 %v825_v58, %v889_v60  ;;  %v1456_v2 = vpop.f32.mrb[40].mxu1 }
 0x1f8   : > { %v846_v3 = vadd.f32 %v1456_v2, %v1751_v19  ;;  %v837_v4 = vpop.f32.mrb[41].mxu1  ;;  %v943_v5 = vpack.c.bf16 %v923_v63, %v922_v61 }
 0x1f9   : > { %v838_v6 = vadd.f32 %v1751_v19, %v837_v4  ;;  %v1457_v7 = vpop.f32.mrb[42].mxu1  ;;  %v942_v8 = vpack.c.bf16 %v921_v1, %v920_v0 }
 0x1fa   : > { %v894_v9 = vmul.f32 0.2, %v846_v3  ;;  %v849_v10 = vadd.f32 %v1457_v7, %v1751_v19  ;;  %v840_v11 = vpop.f32.mrb[43].mxu1 }
 0x1fb   : > { %v892_v12 = vmul.f32 0.2, %v838_v6  ;;  %v841_v13 = vadd.f32 %v1751_v19, %v840_v11  ;;  %1498 = vmatprep.mubr.bf16.mxu0 %v942_v8 }
 0x1fc   : > { %v895_v14 = vmul.f32 0.2, %v849_v10  ;;  %1499 = vmatmul.mubr.bf16.gmra.mrb[36].mxu0 %v943_v5  ;;  %v926_v16 = vmax.f32 %v846_v3, %v894_v9 }
 0x1fd   : > { %v893_v15 = vmul.f32 0.2, %v841_v13  ;;  %v924_v18 = vmax.f32 %v838_v6, %v892_v12 }
 0x1fe   : > { %v927_v17 = vmax.f32 %v849_v10, %v895_v14 }
 0x1ff   : > { %v925_v62 = vmax.f32 %v841_v13, %v893_v15  ;;  %v1460_v53 = vpop.f32.mrb[44].mxu1 }
 0x200   : > { %v862_v48 = vadd.f32 %v1460_v53, %v1751_v19  ;;  %v853_v20 = vpop.f32.mrb[45].mxu1  ;;  %v945_v21 = vpack.c.bf16 %v927_v17, %v926_v16 }
 0x201   : > { %v854_v22 = vadd.f32 %v1751_v19, %v853_v20  ;;  %v1461_v23 = vpop.f32.mrb[46].mxu1  ;;  %v944_v24 = vpack.c.bf16 %v925_v62, %v924_v18 }
 0x202   : > { %v898_v25 = vmul.f32 0.2, %v862_v48  ;;  %v865_v26 = vadd.f32 %v1461_v23, %v1751_v19  ;;  %v856_v27 = vpop.f32.mrb[47].mxu1 }
 0x203   : > { %v896_v28 = vmul.f32 0.2, %v854_v22  ;;  %v857_v29 = vadd.f32 %v1751_v19, %v856_v27  ;;  %1502 = vmatprep.mubr.bf16.mxu0 %v944_v24 }
 0x204   : > { %v899_v30 = vmul.f32 0.2, %v865_v26  ;;  %1503 = vmatmul.mubr.bf16.gmra.mrb[40].mxu0 %v945_v21  ;;  %v930_v32 = vmax.f32 %v862_v48, %v898_v25 }
 0x205   : > { %v897_v31 = vmul.f32 0.2, %v857_v29  ;;  %v928_v34 = vmax.f32 %v854_v22, %v896_v28 }
 0x206   : > { %v931_v33 = vmax.f32 %v865_v26, %v899_v30 }
 0x207   : > { %v929_v35 = vmax.f32 %v857_v29, %v897_v31 }
 0x208   : > { %v947_v36 = vpack.c.bf16 %v931_v33, %v930_v32 }
 0x209   : > { %v946_v37 = vpack.c.bf16 %v929_v35, %v928_v34 }
 0x20b   : > { %1506 = vmatprep.mubr.bf16.mxu0 %v946_v37 }
 0x20c   : > { %1507 = vmatmul.mubr.bf16.gmra.mrb[44].mxu0 %v947_v36 }
 0x2a7   : > { %v1480_v19 = vpop.f32.mrb[16].mxu0 }
 0x2a8   : > { %v1062_v39 = vadd.f32 %v1480_v19, %v1788_v38  ;;  %v1053_v40 = vpop.f32.mrb[17].mxu0 }
 0x2a9   : > { %v1054_v41 = vadd.f32 %v1788_v38, %v1053_v40  ;;  %v1481_v42 = vpop.f32.mrb[18].mxu0 }
 0x2aa   : > { %1182 = vst.msk [vmem:[%s1795_s10 + $0x10] sm:$0xff] %vm346_vm0, %v1062_v39  ;;  %v1065_v43 = vadd.f32 %v1481_v42, %v1788_v38  ;;  %v1056_v44 = vpop.f32.mrb[19].mxu0 }
 0x2ab   : > { %1180 = vst.msk [vmem:[%s1795_s10] sm:$0xff] %vm346_vm0, %v1054_v41  ;;  %v1057_v45 = vadd.f32 %v1788_v38, %v1056_v44 }
 0x2ac   : > { %1183 = vst.msk [vmem:[%s1795_s10 + $0x18] sm:$0xff] %vm346_vm0, %v1065_v43 }
 0x2ad   : > { %1181 = vst.msk [vmem:[%s1795_s10 + $0x8] sm:$0xff] %vm346_vm0, %v1057_v45 }
 0x2af   : > { %v1484_v46 = vpop.f32.mrb[20].mxu0 }
 0x2b0   : > { %v1078_v47 = vadd.f32 %v1484_v46, %v1788_v38  ;;  %v1069_v49 = vpop.f32.mrb[21].mxu0 }
 0x2b1   : > { %v1070_v50 = vadd.f32 %v1788_v38, %v1069_v49  ;;  %v1485_v51 = vpop.f32.mrb[22].mxu0 }
 0x2b2   : > { %1186 = vst.msk [vmem:[%s1795_s10 + $0x30] sm:$0xff] %vm346_vm0, %v1078_v47  ;;  %v1081_v52 = vadd.f32 %v1485_v51, %v1788_v38  ;;  %v1072_v54 = vpop.f32.mrb[23].mxu0 }
 0x2b3   : > { %1184 = vst.msk [vmem:[%s1795_s10 + $0x20] sm:$0xff] %vm346_vm0, %v1070_v50  ;;  %v1073_v55 = vadd.f32 %v1788_v38, %v1072_v54 }
 0x2b4   : > { %1187 = vst.msk [vmem:[%s1795_s10 + $0x38] sm:$0xff] %vm346_vm0, %v1081_v52 }
 0x2b5   : > { %1185 = vst.msk [vmem:[%s1795_s10 + $0x28] sm:$0xff] %vm346_vm0, %v1073_v55 }
 0x2b7   : > { %v1488_v56 = vpop.f32.mrb[24].mxu0 }
 0x2b8   : > { %v1094_v57 = vadd.f32 %v1488_v56, %v1788_v38  ;;  %v1085_v58 = vpop.f32.mrb[25].mxu0 }
 0x2b9   : > { %v1086_v59 = vadd.f32 %v1788_v38, %v1085_v58  ;;  %v1489_v60 = vpop.f32.mrb[26].mxu0 }
 0x2ba   : > { %1190 = vst.msk [vmem:[%s1795_s10 + $0x50] sm:$0xff] %vm346_vm0, %v1094_v57  ;;  %v1097_v61 = vadd.f32 %v1489_v60, %v1788_v38  ;;  %v1088_v63 = vpop.f32.mrb[27].mxu0 }
 0x2bb   : > { %1188 = vst.msk [vmem:[%s1795_s10 + $0x40] sm:$0xff] %vm346_vm0, %v1086_v59  ;;  %v1089_v0 = vadd.f32 %v1788_v38, %v1088_v63 }
 0x2bc   : > { %1191 = vst.msk [vmem:[%s1795_s10 + $0x58] sm:$0xff] %vm346_vm0, %v1097_v61 }
 0x2bd   : > { %1189 = vst.msk [vmem:[%s1795_s10 + $0x48] sm:$0xff] %vm346_vm0, %v1089_v0 }
 0x2bf   : > { %v1492_v1 = vpop.f32.mrb[28].mxu0 }
 0x2c0   : > { %v1110_v2 = vadd.f32 %v1492_v1, %v1788_v38  ;;  %v1101_v3 = vpop.f32.mrb[29].mxu0 }
 0x2c1   : > { %v1102_v4 = vadd.f32 %v1788_v38, %v1101_v3  ;;  %v1493_v5 = vpop.f32.mrb[30].mxu0 }
 0x2c2   : > { %1194 = vst.msk [vmem:[%s1795_s10 + $0x70] sm:$0xff] %vm346_vm0, %v1110_v2  ;;  %v1113_v6 = vadd.f32 %v1493_v5, %v1788_v38  ;;  %v1104_v7 = vpop.f32.mrb[31].mxu0 }
 0x2c3   : > { %1192 = vst.msk [vmem:[%s1795_s10 + $0x60] sm:$0xff] %vm346_vm0, %v1102_v4  ;;  %v1105_v8 = vadd.f32 %v1788_v38, %v1104_v7 }
 0x2c4   : > { %1195 = vst.msk [vmem:[%s1795_s10 + $0x78] sm:$0xff] %vm346_vm0, %v1113_v6 }
 0x2c5   : > { %1193 = vst.msk [vmem:[%s1795_s10 + $0x68] sm:$0xff] %vm346_vm0, %v1105_v8 }
 0x2c7   : > { %v1496_v9 = vpop.f32.mrb[32].mxu0 }
 0x2c8   : > { %v1126_v10 = vadd.f32 %v1496_v9, %v1788_v38  ;;  %v1117_v11 = vpop.f32.mrb[33].mxu0 }
 0x2c9   : > { %v1118_v12 = vadd.f32 %v1788_v38, %v1117_v11  ;;  %v1497_v13 = vpop.f32.mrb[34].mxu0 }
 0x2ca   : > { %1198 = vst.msk [vmem:[%s1795_s10 + $0x90] sm:$0xff] %vm346_vm0, %v1126_v10  ;;  %v1129_v14 = vadd.f32 %v1497_v13, %v1788_v38  ;;  %v1120_v15 = vpop.f32.mrb[35].mxu0 }
 0x2cb   : > { %1196 = vst.msk [vmem:[%s1795_s10 + $0x80] sm:$0xff] %vm346_vm0, %v1118_v12  ;;  %v1121_v16 = vadd.f32 %v1788_v38, %v1120_v15 }
 0x2cc   : > { %1199 = vst.msk [vmem:[%s1795_s10 + $0x98] sm:$0xff] %vm346_vm0, %v1129_v14 }
 0x2cd   : > { %1197 = vst.msk [vmem:[%s1795_s10 + $0x88] sm:$0xff] %vm346_vm0, %v1121_v16 }
 0x2cf   : > { %v1500_v17 = vpop.f32.mrb[36].mxu0 }
 0x2d0   : > { %v1142_v18 = vadd.f32 %v1500_v17, %v1788_v38  ;;  %v1133_v62 = vpop.f32.mrb[37].mxu0 }
 0x2d1   : > { %v1134_v53 = vadd.f32 %v1788_v38, %v1133_v62  ;;  %v1501_v48 = vpop.f32.mrb[38].mxu0 }
 0x2d2   : > { %1202 = vst.msk [vmem:[%s1795_s10 + $0xb0] sm:$0xff] %vm346_vm0, %v1142_v18  ;;  %v1145_v20 = vadd.f32 %v1501_v48, %v1788_v38  ;;  %v1136_v21 = vpop.f32.mrb[39].mxu0 }
 0x2d3   : > { %1200 = vst.msk [vmem:[%s1795_s10 + $0xa0] sm:$0xff] %vm346_vm0, %v1134_v53  ;;  %v1137_v22 = vadd.f32 %v1788_v38, %v1136_v21 }
 0x2d4   : > { %1203 = vst.msk [vmem:[%s1795_s10 + $0xb8] sm:$0xff] %vm346_vm0, %v1145_v20 }
 0x2d5   : > { %1201 = vst.msk [vmem:[%s1795_s10 + $0xa8] sm:$0xff] %vm346_vm0, %v1137_v22 }
 0x2d7   : > { %v1504_v23 = vpop.f32.mrb[40].mxu0 }
 0x2d8   : > { %v1158_v24 = vadd.f32 %v1504_v23, %v1788_v38  ;;  %v1149_v25 = vpop.f32.mrb[41].mxu0 }
 0x2d9   : > { %v1150_v26 = vadd.f32 %v1788_v38, %v1149_v25  ;;  %v1505_v27 = vpop.f32.mrb[42].mxu0 }
 0x2da   : > { %1206 = vst.msk [vmem:[%s1795_s10 + $0xd0] sm:$0xff] %vm346_vm0, %v1158_v24  ;;  %v1161_v28 = vadd.f32 %v1505_v27, %v1788_v38  ;;  %v1152_v29 = vpop.f32.mrb[43].mxu0 }
 0x2db   : > { %1204 = vst.msk [vmem:[%s1795_s10 + $0xc0] sm:$0xff] %vm346_vm0, %v1150_v26  ;;  %v1153_v30 = vadd.f32 %v1788_v38, %v1152_v29 }
 0x2dc   : > { %1207 = vst.msk [vmem:[%s1795_s10 + $0xd8] sm:$0xff] %vm346_vm0, %v1161_v28 }
 0x2dd   : > { %1205 = vst.msk [vmem:[%s1795_s10 + $0xc8] sm:$0xff] %vm346_vm0, %v1153_v30 }
 0x2df   : > { %v1508_v31 = vpop.f32.mrb[44].mxu0 }
 0x2e0   : > { %v1174_v32 = vadd.f32 %v1508_v31, %v1788_v38  ;;  %v1165_v33 = vpop.f32.mrb[45].mxu0 }
 0x2e1   : > { %v1166_v34 = vadd.f32 %v1788_v38, %v1165_v33  ;;  %v1509_v35 = vpop.f32.mrb[46].mxu0 }
 0x2e2   : > { %1210 = vst.msk [vmem:[%s1795_s10 + $0xf0] sm:$0xff] %vm346_vm0, %v1174_v32  ;;  %v1177_v36 = vadd.f32 %v1509_v35, %v1788_v38  ;;  %v1168_v37 = vpop.f32.mrb[47].mxu0 }
 0x2e3   : > { %1208 = vst.msk [vmem:[%s1795_s10 + $0xe0] sm:$0xff] %vm346_vm0, %v1166_v34  ;;  %v1169_v19 = vadd.f32 %v1788_v38, %v1168_v37 }
 0x2e4   : > { %1211 = vst.msk [vmem:[%s1795_s10 + $0xf8] sm:$0xff] %vm346_vm0, %v1177_v36 }
 0x2e5   : > { %1209 = vst.msk [vmem:[%s1795_s10 + $0xe8] sm:$0xff] %vm346_vm0, %v1169_v19 }
 0x2e6 PF: > { %s17_s24 = sadd.s32 1, %s1543_s24  }
 0x2e7   : > { %p14_p4 = scmp.ge.s32.totalorder %s17_s24, 4  }
 0x2e9   :  { %16 = sbr.rel (!%p14_p4) target bundleno = 1 (0x1), region = 78 }

</bundles_post_ra>
